<compile_context>
chip_gen: v7x
topology: tpu7x:2x2x1
jax: 0.10.0
libtpu: 0.0.40
codegen_flags: <defaults>
</compile_context>

<pallas_src>
import functools

import jax
import jax.numpy as jnp
from jax import lax
from jax.experimental import pallas as pl
from jax.experimental.pallas import tpu as pltpu


_VMEM_LIMIT = 64 * 1024 * 1024  # safe scoped-VMEM ceiling across v5e/v6e/v7x


# ---------------------------------------------------------------------------
# Tiled linear:  out[M, N] = x[M, K] @ w[K, N] + b[N]
# ---------------------------------------------------------------------------
def _linear_kernel(x_ref, w_ref, b_ref, o_ref, acc_ref):
    @pl.when(pl.program_id(2) == 0)
    def _():
        acc_ref[...] = jnp.zeros_like(acc_ref)

    # Native-dtype matmul on the MXU with f32 accumulation.
    acc_ref[...] += jnp.dot(x_ref[...], w_ref[...],
                            preferred_element_type=jnp.float32)

    @pl.when(pl.program_id(2) == pl.num_programs(2) - 1)
    def _():
        o_ref[...] = (acc_ref[...] + b_ref[...].astype(jnp.float32)
                      ).astype(o_ref.dtype)


def _pick_tile(dim, candidates):
    for c in candidates:
        if dim >= c and dim % c == 0:
            return c
    # TODO(synk): pad non-multiple dims to a tile multiple instead of using
    # the whole dimension as one block (can blow VMEM for very large dims).
    return dim


def _linear(x, w, b):
    M, K = x.shape
    K2, N = w.shape
    assert K == K2
    tm = _pick_tile(M, (512, 256, 128))
    tn = _pick_tile(N, (512, 384, 256, 128))
    tk = _pick_tile(K, (512, 384, 256, 128))
    b2 = b.reshape(1, N)

    gm, gn, gk = M // tm, N // tn, K // tk
    isz = x.dtype.itemsize
    flops = 2 * M * N * K
    # Count tile re-reads: x re-read gn times, w re-read gm times.
    bytes_accessed = (M * K * isz * gn + K * N * w.dtype.itemsize * gm
                      + N * b.dtype.itemsize * gm + M * N * isz)

    return pl.pallas_call(
        _linear_kernel,
        out_shape=jax.ShapeDtypeStruct((M, N), x.dtype),
        grid_spec=pltpu.PrefetchScalarGridSpec(
            num_scalar_prefetch=0,
            grid=(gm, gn, gk),
            in_specs=[
                pl.BlockSpec((tm, tk), lambda i, j, k: (i, k)),
                pl.BlockSpec((tk, tn), lambda i, j, k: (k, j)),
                pl.BlockSpec((1, tn), lambda i, j, k: (0, j)),
            ],
            out_specs=pl.BlockSpec((tm, tn), lambda i, j, k: (i, j)),
            scratch_shapes=[pltpu.VMEM((tm, tn), jnp.float32)],
        ),
        compiler_params=pltpu.CompilerParams(
            dimension_semantics=("parallel", "parallel", "arbitrary"),
            vmem_limit_bytes=_VMEM_LIMIT),
        cost_estimate=pl.CostEstimate(flops=flops, transcendentals=0,
                                      bytes_accessed=bytes_accessed),
    )(x, w, b2)


# ---------------------------------------------------------------------------
# Flash attention (+ fused RoPE), reading q/k/v directly from the (B, N, 3C)
# qkv activation and writing directly into (B, N, C) layout.
# q/k channels arrive pre-permuted to [even | odd] halves per head (wrapper).
# ---------------------------------------------------------------------------
def _flash_attn_kernel(q_ref, k_ref, v_ref, cq_ref, sq_ref, ck_ref, sk_ref,
                       o_ref, m_ref, l_ref, acc_ref,
                       *, scale, head_dim, heads_per_block, apply_rope):
    kv = pl.program_id(3)
    half = head_dim // 2

    @pl.when(kv == 0)
    def _():
        m_ref[...] = jnp.full(m_ref.shape, -jnp.inf, dtype=jnp.float32)
        l_ref[...] = jnp.zeros(l_ref.shape, dtype=jnp.float32)
        acc_ref[...] = jnp.zeros(acc_ref.shape, dtype=jnp.float32)

    qb = q_ref[0]                     # (tq,  Hg*Dh) native dtype
    kb = k_ref[0]                     # (tkv, Hg*Dh)
    vb = v_ref[0]                     # (tkv, Hg*Dh)
    dtype = qb.dtype

    if apply_rope:
        cq = cq_ref[...]              # (tq,  Dh/2) f32
        sq = sq_ref[...]
        ck = ck_ref[...]              # (tkv, Dh/2) f32
        sk = sk_ref[...]

    def rope(u, cos, sin):
        u = u.astype(jnp.float32)
        ur, ui = u[:, :half], u[:, half:]
        return jnp.concatenate(
            [ur * cos - ui * sin, ur * sin + ui * cos], axis=-1)

    for h in range(heads_per_block):
        sl = slice(h * head_dim, (h + 1) * head_dim)
        q_h = qb[:, sl]
        k_h = kb[:, sl]
        v_h = vb[:, sl]
        if apply_rope:
            q_h = rope(q_h, cq, sq).astype(dtype)
            k_h = rope(k_h, ck, sk).astype(dtype)

        # Single full-depth q.k^T, contracting the last axis of both operands.
        s = lax.dot_general(q_h, k_h, (((1,), (1,)), ((), ())),
                            preferred_element_type=jnp.float32) * scale

        m_prev = m_ref[h]                                     # (tq, 1)
        m_new = jnp.maximum(m_prev, jnp.max(s, axis=-1, keepdims=True))
        alpha = jnp.exp(m_prev - m_new)
        p = jnp.exp(s - m_new)                                # unnormalized
        l_ref[h] = alpha * l_ref[h] + jnp.sum(p, axis=-1, keepdims=True)
        acc_ref[h] = alpha * acc_ref[h] + jnp.dot(
            p.astype(dtype), v_h, preferred_element_type=jnp.float32)
        m_ref[h] = m_new

    @pl.when(kv == pl.num_programs(3) - 1)
    def _():
        outs = []
        for h in range(heads_per_block):
            inv = pl.reciprocal(l_ref[h], approx=True)   # deferred softmax norm
            outs.append(acc_ref[h] * inv)
        # One lane-dense (tq, Hg*Dh) store.
        o_ref[0] = jnp.concatenate(outs, axis=-1).astype(o_ref.dtype)


def _head_group(num_heads, head_dim):
    """Smallest head group whose column width is lane-aligned (mult. of 128)."""
    for g in range(1, num_heads + 1):
        if num_heads % g == 0 and (g * head_dim) % 128 == 0:
            return g
    # TODO(synk): fall back to per-head (masked sub-128-lane) blocks for head
    # layouts where no lane-aligned group exists.
    return num_heads


def _attention_core(qkv3, cos, sin, *, num_heads, head_dim, scale, apply_rope):
    B, N, W3 = qkv3.shape
    C = num_heads * head_dim
    assert W3 == 3 * C
    Hg = _head_group(num_heads, head_dim)
    G = num_heads // Hg                  # number of head groups
    W = Hg * head_dim                    # column width of a q/k/v block
    tq = _pick_tile(N, (256, 128))
    tkv = _pick_tile(N, (256, 128))
    half = head_dim // 2

    kernel = functools.partial(
        _flash_attn_kernel, scale=scale, head_dim=head_dim,
        heads_per_block=Hg, apply_rope=apply_rope)

    return pl.pallas_call(
        kernel,
        out_shape=jax.ShapeDtypeStruct((B, N, C), qkv3.dtype),
        grid_spec=pltpu.PrefetchScalarGridSpec(
            num_scalar_prefetch=0,
            grid=(B, G, N // tq, N // tkv),
            in_specs=[
                # q / k / v column blocks taken straight out of (B, N, 3C).
                pl.BlockSpec((1, tq, W),
                             lambda b, g, qi, kv: (b, qi, g)),
                pl.BlockSpec((1, tkv, W),
                             lambda b, g, qi, kv: (b, kv, G + g)),
                pl.BlockSpec((1, tkv, W),
                             lambda b, g, qi, kv: (b, kv, 2 * G + g)),
                # RoPE tables for q rows and kv rows.
                pl.BlockSpec((tq, half), lambda b, g, qi, kv: (qi, 0)),
                pl.BlockSpec((tq, half), lambda b, g, qi, kv: (qi, 0)),
                pl.BlockSpec((tkv, half), lambda b, g, qi, kv: (kv, 0)),
                pl.BlockSpec((tkv, half), lambda b, g, qi, kv: (kv, 0)),
            ],
            out_specs=pl.BlockSpec((1, tq, W),
                                   lambda b, g, qi, kv: (b, qi, g)),
            scratch_shapes=[
                pltpu.VMEM((Hg, tq, 1), jnp.float32),          # running max
                pltpu.VMEM((Hg, tq, 1), jnp.float32),          # running sum
                pltpu.VMEM((Hg, tq, head_dim), jnp.float32),   # accumulator
            ],
        ),
        compiler_params=pltpu.CompilerParams(
            dimension_semantics=("parallel", "parallel", "parallel",
                                 "arbitrary"),
            vmem_limit_bytes=_VMEM_LIMIT),
    )(qkv3, qkv3, qkv3, cos, sin, cos, sin)


# ---------------------------------------------------------------------------
# Full module forward
# ---------------------------------------------------------------------------
def attention_forward(x, w_qkv, b_qkv, w_proj, b_proj, *, num_heads,
                      apply_rope=True):
    """Attention.forward.

    Args:
      x:      (B, N, C)
      w_qkv:  (C, 3C)   (already transposed: y = x @ w_qkv + b_qkv)
      b_qkv:  (3C,)
      w_proj: (C, C)
      b_proj: (C,)
      num_heads: H, head_dim = C // H (must be even for RoPE).
      apply_rope: mirrors `self.freqs_cos is not None` in the PyTorch forward.
    Returns:
      (B, N, C)
    """
    B, N, C = x.shape
    H = num_heads
    assert C % H == 0
    Dh = C // H
    assert Dh % 2 == 0, "head_dim must be even for interleaved RoPE"
    half = Dh // 2
    scale = float(Dh) ** -0.5

    # Fold the RoPE even/odd de-interleave into the q/k weight columns.
    # q and k are permuted identically, so q.k^T (and the output) is the same
    # math as the reference interleaved layout; v stays in original order.
    # Assumes w_qkv/b_qkv are laid out as [q | k | v] blocks of size C each.
    d = jnp.arange(Dh)
    perm_head = jnp.concatenate([d[0::2], d[1::2]])            # evens | odds
    perm_qk = (jnp.arange(H)[:, None] * Dh + perm_head[None, :]).reshape(-1)
    col_perm = jnp.concatenate([perm_qk, C + perm_qk, 2 * C + jnp.arange(C)])
    w_qkv_p = w_qkv[:, col_perm]
    b_qkv_p = b_qkv[col_perm]

    # --- QKV projection; output stays in (B, N, 3C) -- no HBM transposes ----
    qkv = _linear(x.reshape(B * N, C), w_qkv_p, b_qkv_p).reshape(B, N, 3 * C)

    # --- RoPE tables (init_rope equivalent), kept in f32 ---------------------
    if apply_rope:
        freqs = 1.0 / (10000.0 ** (jnp.arange(0, Dh, 2)[:half]
                                   .astype(jnp.float32) / Dh))
        f = jnp.outer(jnp.arange(N, dtype=jnp.float32), freqs)
        cos = jnp.cos(f)
        sin = jnp.sin(f)
    else:
        cos = jnp.ones((N, half), dtype=jnp.float32)
        sin = jnp.zeros((N, half), dtype=jnp.float32)

    # --- fused RoPE + flash attention (Pallas), output already (B, N, C) ----
    o = _attention_core(qkv, cos, sin, num_heads=H, head_dim=Dh,
                        scale=scale, apply_rope=apply_rope)

    # --- output projection (Pallas tiled matmul) -----------------------------
    # attn_drop / proj_drop are identity (p = 0.0 / eval mode).
    out = _linear(o.reshape(B * N, C), w_proj, b_proj)
    return out.reshape(B, N, C)


# ---------------------------------------------------------------------------
# Pure-JAX reference mirroring the PyTorch module (non-flash, eval path).
# ---------------------------------------------------------------------------
def _reference(x, w_qkv, b_qkv, w_proj, b_proj, *, num_heads, apply_rope=True):
    B, N, C = x.shape
    H = num_heads
    Dh = C // H
    qkv = (x.reshape(B * N, C) @ w_qkv + b_qkv).reshape(B, N, 3, H, Dh)
    qkv = qkv.transpose(2, 0, 3, 1, 4)
    q, k, v = qkv[0], qkv[1], qkv[2]
    if apply_rope:
        half = Dh // 2
        freqs = 1.0 / (10000.0 ** (jnp.arange(0, Dh, 2)[:half]
                                   .astype(jnp.float32) / Dh))
        f = jnp.outer(jnp.arange(N, dtype=jnp.float32), freqs)
        cos, sin = jnp.cos(f), jnp.sin(f)

        def rope(u):
            ur, ui = u[..., 0::2], u[..., 1::2]
            our = ur * cos - ui * sin
            oui = ur * sin + ui * cos
            return jnp.stack([our, oui], axis=-1).reshape(u.shape)

        q, k = rope(q), rope(k)
    attn = jnp.einsum("bhqd,bhkd->bhqk", q, k) * (float(Dh) ** -0.5)
    attn = jax.nn.softmax(attn, axis=-1)
    o = jnp.einsum("bhqk,bhkd->bhqd", attn, v)
    o = o.transpose(0, 2, 1, 3).reshape(B * N, C)
    return (o @ w_proj + b_proj).reshape(B, N, C)


if __name__ == "__main__":
    # Small shapes consistent with the module: (B, N, C), head_dim = C // H.
    B, N, C, H = 2, 32, 128, 4   # head_dim = 32

    key = jax.random.PRNGKey(0)
    kx, kw1, kb1, kw2, kb2 = jax.random.split(key, 5)
    x = jax.random.normal(kx, (B, N, C), dtype=jnp.float32)
    w_qkv = jax.random.normal(kw1, (C, 3 * C), dtype=jnp.float32) * 0.05
    b_qkv = jax.random.normal(kb1, (3 * C,), dtype=jnp.float32) * 0.05
    w_proj = jax.random.normal(kw2, (C, C), dtype=jnp.float32) * 0.05
    b_proj = jax.random.normal(kb2, (C,), dtype=jnp.float32) * 0.05

    # RoPE on (freqs initialized) and off (freqs_cos is None) paths.
    for rope in (True, False):
        out = attention_forward(x, w_qkv, b_qkv, w_proj, b_proj,
                                num_heads=H, apply_rope=rope)
        out = jax.block_until_ready(out)
        ref = _reference(x, w_qkv, b_qkv, w_proj, b_proj,
                         num_heads=H, apply_rope=rope)
        assert out.shape == (B, N, C)
        err = float(jnp.max(jnp.abs(out - ref)))
        assert err < 2e-2, err

    print("KERNEL_OK")
</pallas_src>

<mosaic_0001>
module attributes {stable_mosaic.version = 11 : i64} {
  func.func @_linear_kernel(%arg0: i32, %arg1: i32, %arg2: i32, %arg3: memref<64x128xf32, #tpu.memory_space<vmem>>, %arg4: memref<128x384xf32, #tpu.memory_space<vmem>>, %arg5: memref<1x384xf32, #tpu.memory_space<vmem>>, %arg6: memref<64x384xf32, #tpu.memory_space<vmem>>, %arg7: memref<64x384xf32, #tpu.memory_space<vmem>>) attributes {dimension_semantics = [#tpu.dimension_semantics<parallel>, #tpu.dimension_semantics<parallel>, #tpu.dimension_semantics<arbitrary>], iteration_bounds = array<i64: 1, 1, 1>, scalar_prefetch = 0 : i64, scratch_operands = 1 : i64, tpu.core_type = #tpu.core_type<tc>, window_params = [{transform_indices = @transform_0, window_bounds = array<i64: 64, 128>}, {transform_indices = @transform_1, window_bounds = array<i64: 128, 384>}, {transform_indices = @transform_2, window_bounds = array<i64: 1, 384>}, {transform_indices = @transform_3, window_bounds = array<i64: 64, 384>}]} {
    %c0_i32 = arith.constant 0 : i32
    %0 = arith.cmpi eq, %arg2, %c0_i32 : i32
    %1 = arith.extui %0 : i1 to i32
    %c0_i32_0 = arith.constant 0 : i32
    %2 = arith.cmpi ne, %1, %c0_i32_0 : i32
    scf.if %2 {
      %cst_10 = arith.constant 0.000000e+00 : f32
      %12 = vector.broadcast %cst_10 : f32 to vector<64x384xf32>
      %c0_11 = arith.constant 0 : index
      %c0_12 = arith.constant 0 : index
      %13 = vector.load %arg7[%c0_11, %c0_12] : memref<64x384xf32, #tpu.memory_space<vmem>>, vector<64x384xf32>
      tpu.vector_store %arg7[%c0_11, %c0_12], %12 {strides = array<i32>} : memref<64x384xf32, #tpu.memory_space<vmem>>, vector<64x384xf32>,
    } else {
    }
    %c0 = arith.constant 0 : index
    %c0_1 = arith.constant 0 : index
    %3 = vector.load %arg7[%c0, %c0_1] : memref<64x384xf32, #tpu.memory_space<vmem>>, vector<64x384xf32>
    %c0_2 = arith.constant 0 : index
    %c0_3 = arith.constant 0 : index
    %4 = vector.load %arg3[%c0_2, %c0_3] : memref<64x128xf32, #tpu.memory_space<vmem>>, vector<64x128xf32>
    %c0_4 = arith.constant 0 : index
    %c0_5 = arith.constant 0 : index
    %5 = vector.load %arg4[%c0_4, %c0_5] : memref<128x384xf32, #tpu.memory_space<vmem>>, vector<128x384xf32>
    %cst = arith.constant dense<0.000000e+00> : vector<64x384xf32>
    %6 = tpu.matmul %4, %5, %cst {dimension_numbers = #tpu.dot_dimension_numbers<[1], [0], [0], [1], [0, 0, 1, 1], [], []>} : vector<64x128xf32>, vector<128x384xf32>, vector<64x384xf32> -> vector<64x384xf32>
    %7 = arith.addf %3, %6 : vector<64x384xf32>
    %c0_6 = arith.constant 0 : index
    %c0_7 = arith.constant 0 : index
    %8 = vector.load %arg7[%c0_6, %c0_7] : memref<64x384xf32, #tpu.memory_space<vmem>>, vector<64x384xf32>
    tpu.vector_store %arg7[%c0_6, %c0_7], %7 {strides = array<i32>} : memref<64x384xf32, #tpu.memory_space<vmem>>, vector<64x384xf32>,
    %c0_i32_8 = arith.constant 0 : i32
    %9 = arith.cmpi eq, %arg2, %c0_i32_8 : i32
    %10 = arith.extui %9 : i1 to i32
    %c0_i32_9 = arith.constant 0 : i32
    %11 = arith.cmpi ne, %10, %c0_i32_9 : i32
    scf.if %11 {
      %c0_10 = arith.constant 0 : index
      %c0_11 = arith.constant 0 : index
      %12 = vector.load %arg7[%c0_10, %c0_11] : memref<64x384xf32, #tpu.memory_space<vmem>>, vector<64x384xf32>
      %c0_12 = arith.constant 0 : index
      %c0_13 = arith.constant 0 : index
      %13 = vector.load %arg5[%c0_12, %c0_13] : memref<1x384xf32, #tpu.memory_space<vmem>>, vector<1x384xf32>
      %14 = vector.broadcast %13 : vector<1x384xf32> to vector<64x384xf32>
      %15 = arith.addf %12, %14 : vector<64x384xf32>
      %c0_14 = arith.constant 0 : index
      %c0_15 = arith.constant 0 : index
      %16 = vector.load %arg6[%c0_14, %c0_15] : memref<64x384xf32, #tpu.memory_space<vmem>>, vector<64x384xf32>
      tpu.vector_store %arg6[%c0_14, %c0_15], %15 {strides = array<i32>} : memref<64x384xf32, #tpu.memory_space<vmem>>, vector<64x384xf32>,
    } else {
    }
    return
  }
  func.func @transform_0(%arg0: i32, %arg1: i32, %arg2: i32) -> (i32, i32) {
    %c0_i32 = arith.constant 0 : i32
    return %arg0, %arg2 : i32, i32
  }
  func.func @transform_1(%arg0: i32, %arg1: i32, %arg2: i32) -> (i32, i32) {
    %c0_i32 = arith.constant 0 : i32
    return %arg2, %arg1 : i32, i32
  }
  func.func @transform_2(%arg0: i32, %arg1: i32, %arg2: i32) -> (i32, i32) {
    %c0_i32 = arith.constant 0 : i32
    %c0_i32_0 = arith.constant 0 : i32
    return %c0_i32, %arg1 : i32, i32
  }
  func.func @transform_3(%arg0: i32, %arg1: i32, %arg2: i32) -> (i32, i32) {
    %c0_i32 = arith.constant 0 : i32
    return %arg0, %arg1 : i32, i32
  }
}

</mosaic_0001>

<bundles_post_ra>
// kernel: tpu_custom_call.1
= control target key start
LH: loop header
LB: loop body
LE: loop exit
PB: predicated region body
PF: predicated region fallthrough
CT: control target
= control target key end

     0   :  { %8 = vsyncpa [#allocation4], 0  ;;  %s884_s0 = inlined_call_operand.hbm [shape: f32[64,128], index: 0, kind: input, shape index: {}]   ;;  %s885_s1 = inlined_call_operand.hbm [shape: f32[128,384], index: 1, kind: input, shape index: {}]   ;;  %s886_s2 = inlined_call_operand.hbm [shape: f32[1,384], index: 2, kind: input, shape index: {}]   ;;  %s887_s3 = inlined_call_operand.hbm [shape: f32[64,384], index: 3, kind: output, shape index: {}]  }
   0x1   :  { %9 = vsyncpa [#allocation7], 0 }
   0x2   :  { %10 = vsyncpa [#allocation5], 0  ;;  %s773_s12 = smov [#allocation6]   ;;  %s679_s16 = scalar_lea.hbm %s885_s1, 6144 }
   0x3   :  { %s28_s13 = sshll.u32 %s773_s12, 4  ;;  %p680_p0 = scmp.ne.s32.totalorder %s885_s1, %s679_s16  ;;  %s29_s13 = int_to_ptr.vmem [resolvable:$true] %s28_s13 }
   0x4   :  { %p683_p1 = scmp.lt.u32.totalorder %s679_s16, %s885_s1 }
   0x6   :  { %p685_p2 = pnand %p683_p1, %p680_p0 }
   0x8   :  { %688 = shalt.err (!%p685_p2)
}
   0x9   :  { %s689_s21 = scalar_lea.vmem %s29_s13, 6144  ;;  %p694_p4 = scmp.lt.s32.totalorder %s29_s13, %s29_s13 }
   0xa   :  { %p690_p3 = scmp.ne.s32.totalorder %s29_s13, %s689_s21  ;;  %p695_p5 = scmp.lt.s32.totalorder %s689_s21, %s689_s21 }
   0xc   :  { %p696_p6 = por %p695_p5, %p694_p4 }
   0xe   :  { %p697_p7 = pnand %p696_p6, %p690_p3 }
  0x10   :  { %700 = shalt.err (!%p697_p7)
}
  0x11   :  { %s774_s22 = smov 384   ;;  %s775_s23 = smov 24  }
  0x12   :  { %34 = dma.hbm_to_vmem [thread:$0]  %s885_s1, 6144, %s29_s13, [#allocation7], %s774_s22, %s774_s22, %s775_s23  }
  0x13   :  { %s776_s26 = smov [#allocation3]   ;;  %s701_s30 = scalar_lea.hbm %s884_s0, 1024 }
  0x14   :  { %s16_s27 = sshll.u32 %s776_s26, 4  ;;  %p702_p8 = scmp.ne.s32.totalorder %s884_s0, %s701_s30  ;;  %s17_s27 = int_to_ptr.vmem [resolvable:$true] %s16_s27 }
  0x15   :  { %p705_p9 = scmp.lt.u32.totalorder %s701_s30, %s884_s0 }
  0x17   :  { %p707_p10 = pnand %p705_p9, %p702_p8 }
  0x19   :  { %710 = shalt.err (!%p707_p10)
}
  0x1a   :  { %s711_s8 = scalar_lea.vmem %s17_s27, 1024  ;;  %p716_p12 = scmp.lt.s32.totalorder %s17_s27, %s17_s27 }
  0x1b   :  { %p712_p11 = scmp.ne.s32.totalorder %s17_s27, %s711_s8  ;;  %p717_p13 = scmp.lt.s32.totalorder %s711_s8, %s711_s8 }
  0x1d   :  { %p718_p0 = por %p717_p13, %p716_p12 }
  0x1f   :  { %p719_p1 = pnand %p718_p0, %p712_p11 }
  0x21   :  { %722 = shalt.err (!%p719_p1)
}
  0x22   :  { %s777_s1 = smov 128   ;;  %s778_s9 = smov 8  }
  0x23   :  { %22 = dma.hbm_to_vmem [thread:$0]  %s884_s0, 1024, %s17_s27, [#allocation4], %s777_s1, %s777_s1, %s778_s9  }
  0x24   :  { %s779_s12 = smov [#allocation8]   ;;  %s723_s16 = scalar_lea.hbm %s886_s2, 48 }
  0x25   :  { %s41_s13 = sshll.u32 %s779_s12, 4  ;;  %p724_p2 = scmp.ne.s32.totalorder %s886_s2, %s723_s16  ;;  %s42_s13 = int_to_ptr.vmem [resolvable:$true] %s41_s13 }
  0x26   :  { %p727_p3 = scmp.lt.u32.totalorder %s723_s16, %s886_s2 }
  0x28   :  { %p729_p4 = pnand %p727_p3, %p724_p2 }
  0x2a   :  { %732 = shalt.err (!%p729_p4)
}
  0x2b   :  { %s733_s21 = scalar_lea.vmem %s42_s13, 48  ;;  %s737_s0 = scalar_lea.vmem %s42_s13, 64 }
  0x2c   :  { %p734_p5 = scmp.ne.s32.totalorder %s42_s13, %s733_s21  ;;  %p738_p6 = scmp.lt.s32.totalorder %s42_s13, %s42_s13 }
  0x2d   :  { %p739_p7 = scmp.lt.s32.totalorder %s737_s0, %s733_s21 }
  0x2f   :  { %p740_p8 = por %p739_p7, %p738_p6 }
  0x31   :  { %p741_p9 = pnand %p740_p8, %p734_p5 }
  0x33   :  { %744 = shalt.err (!%p741_p9)
}
  0x34   :  { %44 = dma.hbm_to_vmem [thread:$0]  %s886_s2, 48, %s42_s13, [#allocation7]  }
  0x35   :  { %767 = dma.done.wait [#allocation4], 1024  }
  0x36   :  { %768 = vsyncadd [#allocation4], 4294966272 }
  0x37   :  { %769 = dma.done.wait [#allocation7], 6192  }
  0x38   :  { %770 = vsyncadd [#allocation7], 4294961104  ;;  %v780_v0 = vmov 0.0   ;;  %v115_v1 = vld [vmem:[#allocation6 + $0x8] sm:$0xff]  ;;  %v118_v2 = vld [vmem:[#allocation6 + $0x20] sm:$0xff]  ;;  %s781_s2 = smov [#allocation9]  }
  0x39   :  { %226 = vmatprep.mubr.f32.mxu0 %v780_v0  ;;  %v114_v3 = vld [vmem:[#allocation6] sm:$0xff]  ;;  %v606_v4 = vpack.c.bf16 %v118_v2, %v115_v1  ;;  %v117_v5 = vld [vmem:[#allocation6 + $0x18] sm:$0xff]  ;;  %v124_v7 = vld [vmem:[#allocation6 + $0x50] sm:$0xff]  ;;  %s525_s26 = sshll.u32 %s781_s2, 4  ;;  %s526_s26 = int_to_ptr.vmem [resolvable:$true] %s525_s26 }
  0x3a   :  { %v121_v6 = vld [vmem:[#allocation6 + $0x38] sm:$0xff]  ;;  %v608_v8 = vpack.c.bf16 %v117_v5, %v114_v3  ;;  %v120_v10 = vld [vmem:[#allocation6 + $0x30] sm:$0xff]  ;;  %v123_v11 = vld [vmem:[#allocation6 + $0x48] sm:$0xff]  ;;  %s745_s27 = scalar_lea.vmem %s526_s26, 3072  ;;  %p750_p11 = scmp.lt.s32.totalorder %s526_s26, %s526_s26 }
  0x3b   :  { %v610_v9 = vpack.c.bf16 %v124_v7, %v121_v6  ;;  %v127_v12 = vld [vmem:[#allocation6 + $0x68] sm:$0xff]  ;;  %607 = vmatprep.subr.bf16.mxu0 %v606_v4  ;;  %v130_v13 = vld [vmem:[#allocation6 + $0x80] sm:$0xff]  ;;  %v612_v14 = vpack.c.bf16 %v123_v11, %v120_v10  ;;  %v129_v17 = vld [vmem:[#allocation6 + $0x78] sm:$0xff]  ;;  %p746_p10 = scmp.ne.s32.totalorder %s526_s26, %s745_s27  ;;  %p751_p12 = scmp.lt.s32.totalorder %s745_s27, %s745_s27 }
  0x3c   :  { %609 = vmatpush1.bf16.msra.mxu0 %v608_v8  ;;  %v126_v15 = vld [vmem:[#allocation6 + $0x60] sm:$0xff]  ;;  %v614_v16 = vpack.c.bf16 %v130_v13, %v127_v12  ;;  %v116_v18 = vld [vmem:[#allocation6 + $0x10] sm:$0xff]  ;;  %v119_v19 = vld [vmem:[#allocation6 + $0x28] sm:$0xff] }
  0x3d   :  { %611 = vmatprep.subr.bf16.mxu0 %v610_v9  ;;  %v133_v20 = vld [vmem:[#allocation6 + $0x98] sm:$0xff]  ;;  %v136_v21 = vld [vmem:[#allocation6 + $0xb0] sm:$0xff]  ;;  %v638_v22 = vpack.c.bf16 %v119_v19, %v116_v18  ;;  %v122_v23 = vld [vmem:[#allocation6 + $0x40] sm:$0xff]  ;;  %v616_v25 = vpack.c.bf16 %v129_v17, %v126_v15  ;;  %v457_v18 = vlaneseq  ;;  %p752_p13 = por %p751_p12, %p750_p11 }
  0x3e   :  { %v125_v24 = vld [vmem:[#allocation6 + $0x58] sm:$0xff]  ;;  %v132_v26 = vld [vmem:[#allocation6 + $0x90] sm:$0xff]  ;;  %v618_v28 = vpack.c.bf16 %v136_v21, %v133_v20  ;;  %v135_v29 = vld [vmem:[#allocation6 + $0xa8] sm:$0xff] }
  0x3f   :  { %639 = vmatprep.subr.bf16.mxu1 %v638_v22  ;;  %v642_v27 = vpack.c.bf16 %v125_v24, %v122_v23  ;;  %v128_v30 = vld [vmem:[#allocation6 + $0x70] sm:$0xff]  ;;  %v131_v31 = vld [vmem:[#allocation6 + $0x88] sm:$0xff]  ;;  %v142_v33 = vld [vmem:[#allocation6 + $0xe0] sm:$0xff]  ;;  %v620_v37 = vpack.c.bf16 %v135_v29, %v132_v26  ;;  %v458_v19 = vshrl.u32 %v457_v18, 7  ;;  %p753_p0 = pnand %p752_p13, %p746_p10 }
  0x40   :  { %613 = vmatpush1.bf16.msra.mxu0 %v612_v14  ;;  %641 = vmatpush3.bf16.msra.mxu1 %v638_v22  ;;  %v139_v32 = vld [vmem:[#allocation6 + $0xc8] sm:$0xff]  ;;  %v646_v34 = vpack.c.bf16 %v131_v31, %v128_v30  ;;  %v134_v35 = vld [vmem:[#allocation6 + $0xa0] sm:$0xff]  ;;  %v137_v36 = vld [vmem:[#allocation6 + $0xb8] sm:$0xff] }
  0x41   :  { %615 = vmatprep.subr.bf16.mxu0 %v614_v16  ;;  %643 = vmatprep.subr.bf16.mxu1 %v642_v27  ;;  %v622_v38 = vpack.c.bf16 %v142_v33, %v139_v32  ;;  %v138_v39 = vld [vmem:[#allocation6 + $0xc0] sm:$0xff]  ;;  %v141_v40 = vld [vmem:[#allocation6 + $0xd8] sm:$0xff]  ;;  %v148_v42 = vld [vmem:[#allocation6 + $0x110] sm:$0xff]  ;;  %v650_v43 = vpack.c.bf16 %v137_v36, %v134_v35  ;;  %v459_v20 = vsub.s32 0, %v458_v19  ;;  %v463_v22 = vsub.s32 1, %v458_v19 }
  0x42   :  { %v145_v41 = vld [vmem:[#allocation6 + $0xf8] sm:$0xff]  ;;  %v106_v44 = vld [vmem:[#allocation3] sm:$0xff]  ;;  %v140_v45 = vld [vmem:[#allocation6 + $0xd0] sm:$0xff]  ;;  %v624_v47 = vpack.c.bf16 %v141_v40, %v138_v39 }
  0x43   :  { %v143_v46 = vld [vmem:[#allocation6 + $0xe8] sm:$0xff]  ;;  %594 = vmatprep.mubr.f32.mxu1 %v106_v44  ;;  %v626_v48 = vpack.c.bf16 %v148_v42, %v145_v41  ;;  %v144_v49 = vld [vmem:[#allocation6 + $0xf0] sm:$0xff]  ;;  %v154_v52 = vld [vmem:[#allocation6 + $0x140] sm:$0xff] }
  0x44   :  { %617 = vmatpush1.bf16.msra.mxu0 %v616_v25  ;;  %645 = vmatpush3.bf16.msra.mxu1 %v642_v27  ;;  %v147_v50 = vld [vmem:[#allocation6 + $0x108] sm:$0xff]  ;;  %v654_v53 = vpack.c.bf16 %v143_v46, %v140_v45  ;;  %v146_v54 = vld [vmem:[#allocation6 + $0x100] sm:$0xff]  ;;  %v149_v55 = vld [vmem:[#allocation6 + $0x118] sm:$0xff]  ;;  %v467_v25 = vsub.s32 2, %v458_v19 }
  0x45   :  { %619 = vmatprep.subr.bf16.mxu0 %v618_v28  ;;  %647 = vmatprep.subr.bf16.mxu1 %v646_v34  ;;  %v151_v51 = vld [vmem:[#allocation6 + $0x128] sm:$0xff]  ;;  %v628_v56 = vpack.c.bf16 %v147_v50, %v144_v49  ;;  %v150_v58 = vld [vmem:[#allocation6 + $0x120] sm:$0xff]  ;;  %v153_v59 = vld [vmem:[#allocation6 + $0x138] sm:$0xff]  ;;  %v658_v62 = vpack.c.bf16 %v149_v55, %v146_v54 }
  0x46   :  { %v630_v57 = vpack.c.bf16 %v154_v52, %v151_v51  ;;  %v157_v60 = vld [vmem:[#allocation6 + $0x158] sm:$0xff]  ;;  %v160_v61 = vld [vmem:[#allocation6 + $0x170] sm:$0xff]  ;;  %v155_v1 = vld [vmem:[#allocation6 + $0x148] sm:$0xff]  ;;  %v632_v2 = vpack.c.bf16 %v153_v59, %v150_v58 }
  0x47   :  { %v152_v63 = vld [vmem:[#allocation6 + $0x130] sm:$0xff]  ;;  %v634_v3 = vpack.c.bf16 %v160_v61, %v157_v60  ;;  %v159_v5 = vld [vmem:[#allocation6 + $0x168] sm:$0xff]  ;;  %v158_v7 = vld [vmem:[#allocation6 + $0x160] sm:$0xff] }
  0x48   :  { %621 = vmatpush1.bf16.msra.mxu0 %v620_v37  ;;  %649 = vmatpush3.bf16.msra.mxu1 %v646_v34  ;;  %v156_v4 = vld [vmem:[#allocation6 + $0x150] sm:$0xff]  ;;  %v662_v6 = vpack.c.bf16 %v155_v1, %v152_v63  ;;  %v161_v8 = vld [vmem:[#allocation6 + $0x178] sm:$0xff]  ;;  %v107_v11 = vld [vmem:[#allocation3 + $0x8] sm:$0xff] }
  0x49   :  { %623 = vmatprep.subr.bf16.mxu0 %v622_v38  ;;  %651 = vmatprep.subr.bf16.mxu1 %v650_v43  ;;  %v636_v9 = vpack.c.bf16 %v159_v5, %v156_v4  ;;  %v666_v10 = vpack.c.bf16 %v161_v8, %v158_v7  ;;  %v108_v12 = vld [vmem:[#allocation3 + $0x10] sm:$0xff]  ;;  %v109_v13 = vld [vmem:[#allocation3 + $0x18] sm:$0xff]  ;;  %v110_v14 = vld [vmem:[#allocation3 + $0x20] sm:$0xff] }
  0x4a   :  { %v111_v15 = vld [vmem:[#allocation3 + $0x28] sm:$0xff]  ;;  %v112_v16 = vld [vmem:[#allocation3 + $0x30] sm:$0xff]  ;;  %v113_v17 = vld [vmem:[#allocation3 + $0x38] sm:$0xff] }
  0x4b   :  { %v455_v21 = vld [vmem:[#allocation8] sm:$0x7] }
  0x4c   :  { %625 = vmatpush1.bf16.msra.mxu0 %v624_v47  ;;  %653 = vmatpush3.bf16.msra.mxu1 %v650_v43  ;;  %v849_v23 = vrot.slane %v455_v21, %v459_v20  ;;  %v851_v24 = vrot.slane %v455_v21, %v463_v22  ;;  %v468_v30 = vrot.slane %v455_v21, %v467_v25 }
  0x4d   :  { %627 = vmatprep.subr.bf16.mxu0 %v626_v48  ;;  %655 = vmatprep.subr.bf16.mxu1 %v654_v53 }
  0x50   :  { %629 = vmatpush1.bf16.msra.mxu0 %v628_v56  ;;  %657 = vmatpush3.bf16.msra.mxu1 %v654_v53 }
  0x51   :  { %631 = vmatprep.subr.bf16.mxu0 %v630_v57  ;;  %659 = vmatprep.subr.bf16.mxu1 %v658_v62 }
  0x54   :  { %633 = vmatpush1.bf16.msra.mxu0 %v632_v2  ;;  %661 = vmatpush3.bf16.msra.mxu1 %v658_v62 }
  0x55   :  { %635 = vmatprep.subr.bf16.mxu0 %v634_v3  ;;  %663 = vmatprep.subr.bf16.mxu1 %v662_v6 }
  0x58   :  { %637 = vmatpush1.bf16.msra.mxu0 %v636_v9  ;;  %665 = vmatpush3.bf16.msra.mxu1 %v662_v6 }
  0x59   :  { %667 = vmatprep.subr.bf16.mxu1 %v666_v10 }
  0x5b   :  { %227 = vmatmul.mubr.f32.vlgmr.msra.gmra.mrb[0].mxu0 %v106_v44 }
  0x5c   :  { %232 = vmatprep.mubr.f32.mxu0 %v780_v0  ;;  %669 = vmatpush3.bf16.msra.mxu1 %v666_v10 }
  0x5f   :  { %233 = vmatmul.mubr.f32.gmra.mrb[2].mxu0 %v107_v11  ;;  %595 = vmatmul.mubr.f32.vlgmr.msra.gmra.mrb[0].mxu1 %v107_v11 }
  0x60   :  { %238 = vmatprep.mubr.f32.mxu0 %v780_v0  ;;  %597 = vmatprep.mubr.f32.mxu1 %v108_v12 }
  0x63   :  { %239 = vmatmul.mubr.f32.gmra.mrb[4].mxu0 %v108_v12  ;;  %598 = vmatmul.mubr.f32.gmra.mrb[2].mxu1 %v109_v13 }
  0x64   :  { %244 = vmatprep.mubr.f32.mxu0 %v780_v0  ;;  %600 = vmatprep.mubr.f32.mxu1 %v110_v14 }
  0x67   :  { %245 = vmatmul.mubr.f32.gmra.mrb[6].mxu0 %v109_v13  ;;  %601 = vmatmul.mubr.f32.gmra.mrb[4].mxu1 %v111_v15 }
  0x68   :  { %250 = vmatprep.mubr.f32.mxu0 %v780_v0  ;;  %603 = vmatprep.mubr.f32.mxu1 %v112_v16 }
  0x6b   :  { %251 = vmatmul.mubr.f32.gmra.mrb[8].mxu0 %v110_v14  ;;  %604 = vmatmul.mubr.f32.gmra.mrb[6].mxu1 %v113_v17 }
  0x6c   :  { %256 = vmatprep.mubr.f32.mxu0 %v780_v0 }
  0x6f   :  { %257 = vmatmul.mubr.f32.gmra.mrb[10].mxu0 %v111_v15 }
  0x70   :  { %262 = vmatprep.mubr.f32.mxu0 %v780_v0 }
  0x73   :  { %263 = vmatmul.mubr.f32.gmra.mrb[12].mxu0 %v112_v16 }
  0x74   :  { %268 = vmatprep.mubr.f32.mxu0 %v780_v0 }
  0x77   :  { %269 = vmatmul.mubr.f32.gmra.mrb[14].mxu0 %v113_v17 }
 0x12e   :  { %v228_v26 = vpop.f32.mrb[0].mxu0 }
 0x12f   :  { %v472_v27 = vadd.f32 %v849_v23, %v228_v26  ;;  %v230_v28 = vpop.f32.mrb[1].mxu0 }
 0x130   :  { %v473_v29 = vadd.f32 %v851_v24, %v230_v28 }
 0x131   :  { %496 = vst [vmem:[#allocation9] sm:$0xff] %v472_v27 }
 0x132   :  { %497 = vst [vmem:[#allocation9 + $0x8] sm:$0xff] %v473_v29  ;;  %v234_v0 = vpop.f32.mrb[2].mxu0  ;;  %v596_v33 = vpop.f32.mrb[0].mxu1 }
 0x133   :  { %v475_v31 = vadd.f32 %v849_v23, %v234_v0  ;;  %v236_v32 = vpop.f32.mrb[3].mxu0  ;;  %v477_v35 = vadd.f32 %v596_v33, %v468_v30  ;;  %v341_v36 = vpop.f32.mrb[1].mxu1 }
 0x134   :  { %v476_v34 = vadd.f32 %v851_v24, %v236_v32  ;;  %v474_v37 = vadd.f32 %v468_v30, %v341_v36 }
 0x135   :  { %499 = vst [vmem:[#allocation9 + $0x18] sm:$0xff] %v475_v31  ;;  %501 = vst [vmem:[#allocation9 + $0x28] sm:$0xff] %v477_v35 }
 0x136   :  { %500 = vst [vmem:[#allocation9 + $0x20] sm:$0xff] %v476_v34  ;;  %v240_v38 = vpop.f32.mrb[4].mxu0  ;;  %498 = vst [vmem:[#allocation9 + $0x10] sm:$0xff] %v474_v37  ;;  %v599_v41 = vpop.f32.mrb[2].mxu1 }
 0x137   :  { %v478_v39 = vadd.f32 %v849_v23, %v240_v38  ;;  %v242_v40 = vpop.f32.mrb[5].mxu0  ;;  %v483_v43 = vadd.f32 %v599_v41, %v468_v30  ;;  %v351_v44 = vpop.f32.mrb[3].mxu1 }
 0x138   :  { %v479_v42 = vadd.f32 %v851_v24, %v242_v40  ;;  %v480_v45 = vadd.f32 %v468_v30, %v351_v44 }
 0x139   :  { %502 = vst [vmem:[#allocation9 + $0x30] sm:$0xff] %v478_v39  ;;  %507 = vst [vmem:[#allocation9 + $0x58] sm:$0xff] %v483_v43 }
 0x13a   :  { %503 = vst [vmem:[#allocation9 + $0x38] sm:$0xff] %v479_v42  ;;  %v246_v46 = vpop.f32.mrb[6].mxu0  ;;  %504 = vst [vmem:[#allocation9 + $0x40] sm:$0xff] %v480_v45  ;;  %v602_v49 = vpop.f32.mrb[4].mxu1 }
 0x13b   :  { %v481_v47 = vadd.f32 %v849_v23, %v246_v46  ;;  %v248_v48 = vpop.f32.mrb[7].mxu0  ;;  %v489_v51 = vadd.f32 %v602_v49, %v468_v30  ;;  %v361_v52 = vpop.f32.mrb[5].mxu1 }
 0x13c   :  { %v482_v50 = vadd.f32 %v851_v24, %v248_v48  ;;  %v486_v53 = vadd.f32 %v468_v30, %v361_v52 }
 0x13d   :  { %505 = vst [vmem:[#allocation9 + $0x48] sm:$0xff] %v481_v47  ;;  %513 = vst [vmem:[#allocation9 + $0x88] sm:$0xff] %v489_v51 }
 0x13e   :  { %506 = vst [vmem:[#allocation9 + $0x50] sm:$0xff] %v482_v50  ;;  %v252_v54 = vpop.f32.mrb[8].mxu0  ;;  %510 = vst [vmem:[#allocation9 + $0x70] sm:$0xff] %v486_v53  ;;  %v605_v57 = vpop.f32.mrb[6].mxu1 }
 0x13f   :  { %v484_v55 = vadd.f32 %v849_v23, %v252_v54  ;;  %v254_v56 = vpop.f32.mrb[9].mxu0  ;;  %v495_v59 = vadd.f32 %v605_v57, %v468_v30  ;;  %v371_v60 = vpop.f32.mrb[7].mxu1 }
 0x140   :  { %v485_v58 = vadd.f32 %v851_v24, %v254_v56  ;;  %v492_v61 = vadd.f32 %v468_v30, %v371_v60 }
 0x141   :  { %508 = vst [vmem:[#allocation9 + $0x60] sm:$0xff] %v484_v55  ;;  %519 = vst [vmem:[#allocation9 + $0xb8] sm:$0xff] %v495_v59 }
 0x142   :  { %509 = vst [vmem:[#allocation9 + $0x68] sm:$0xff] %v485_v58  ;;  %v258_v62 = vpop.f32.mrb[10].mxu0  ;;  %516 = vst [vmem:[#allocation9 + $0xa0] sm:$0xff] %v492_v61 }
 0x143   :  { %v487_v63 = vadd.f32 %v849_v23, %v258_v62  ;;  %v260_v1 = vpop.f32.mrb[11].mxu0 }
 0x144   :  { %v488_v2 = vadd.f32 %v851_v24, %v260_v1 }
 0x145   :  { %511 = vst [vmem:[#allocation9 + $0x78] sm:$0xff] %v487_v63 }
 0x146   :  { %512 = vst [vmem:[#allocation9 + $0x80] sm:$0xff] %v488_v2  ;;  %v264_v3 = vpop.f32.mrb[12].mxu0 }
 0x147   :  { %v490_v4 = vadd.f32 %v849_v23, %v264_v3  ;;  %v266_v5 = vpop.f32.mrb[13].mxu0 }
 0x148   :  { %v491_v6 = vadd.f32 %v851_v24, %v266_v5 }
 0x149   :  { %514 = vst [vmem:[#allocation9 + $0x90] sm:$0xff] %v490_v4 }
 0x14a   :  { %515 = vst [vmem:[#allocation9 + $0x98] sm:$0xff] %v491_v6  ;;  %v270_v7 = vpop.f32.mrb[14].mxu0 }
 0x14b   :  { %v493_v8 = vadd.f32 %v849_v23, %v270_v7  ;;  %v272_v9 = vpop.f32.mrb[15].mxu0 }
 0x14c   :  { %v494_v10 = vadd.f32 %v851_v24, %v272_v9 }
 0x14d   :  { %517 = vst [vmem:[#allocation9 + $0xa8] sm:$0xff] %v493_v8 }
 0x14e   :  { %518 = vst [vmem:[#allocation9 + $0xb0] sm:$0xff] %v494_v10 }
 0x14f   :  { %756 = shalt.err (!%p753_p0)
}
 0x150   :  { %s757_s30 = scalar_lea.hbm %s887_s3, 3072 }
 0x151   :  { %p758_p1 = scmp.ne.s32.totalorder %s887_s3, %s757_s30  ;;  %p761_p2 = scmp.lt.u32.totalorder %s757_s30, %s887_s3 }
 0x153   :  { %p763_p3 = pnand %p761_p2, %p758_p1 }
 0x155   :  { %766 = shalt.err (!%p763_p3)
}
 0x156   :  { %531 = dma.vmem_to_hbm [thread:$0]  %s526_s26, 3072, %s887_s3, [#allocation5], %s774_s22, %s774_s22, %s775_s23  }
 0x157   :  { %771 = dma.done.wait [#allocation5], 3072  }
 0x158   :  { %772 = vsyncadd [#allocation5], 4294964224 }
 0x159   :  { %535 = vsyncpa [#allocation4], 1 }
 0x15a   :  { %536 = vsyncpa [#allocation7], 1 }
 0x15b   :  { %537 = vsyncpa [#allocation5], 1 }

</bundles_post_ra>
